<compile_context>
chip_gen: v5e
topology: v5e:2x2
jax: 0.10.0
libtpu: 0.0.40
codegen_flags: <defaults>
</compile_context>

<pallas_src>
import functools

import jax
import jax.numpy as jnp
from jax import lax
from jax.experimental import pallas as pl
from jax.experimental.pallas import tpu as pltpu

EPS = 1e-8


# ---------------------------------------------------------------------------
# Hardware-aware defaults.
# ---------------------------------------------------------------------------
def _tpu_kind():
    try:
        return jax.devices()[0].device_kind.lower()
    except Exception:
        return ""


def _mxu_lane_target():
    # v6e/v7x MXUs are 256 wide; v5e (and older) are 128 wide, where KW=128 is
    # already a full tile and 256 only doubles the f32 intermediates.
    kind = _tpu_kind()
    return 256 if any(tag in kind for tag in ("v6", "v7", "7x")) else 128


def _vmem_limit_bytes():
    # ~75% of physical VMEM: headroom for compiler scratch / DMA semaphores.
    # (v7x: 64 MiB -> 48 MiB; v5e/v6e: 128 MiB -> 96 MiB.)
    cap_mib = 128
    try:
        cap_mib = int(pltpu.get_tpu_info().vmem_capacity_bytes) // (1024 * 1024)
    except Exception:
        if any(tag in _tpu_kind() for tag in ("v7", "7x")):
            cap_mib = 64
    return (cap_mib * 3 // 4) * 1024 * 1024


# ---------------------------------------------------------------------------
# Kernel: scores for one (image block) x (caption block) grid cell.
# ---------------------------------------------------------------------------
def _score_kernel(img_ref, w1sq_ref, rmask_ref, cap_ref, wmask_ref, out_ref, *,
                  lambda_softmax, lambda_lse, words_per_caption, regions):
    img = img_ref[0]                      # (BR, D)  mm dtype (bf16 or f32)
    cap = cap_ref[0]                      # (KW, D)  mm dtype
    w1sq = w1sq_ref[0]                    # (BR, 1)  f32: per-region |img|^2
    rmask = rmask_ref[0]                  # (BR, 1)  f32: 1 for real regions
    wmask = wmask_ref[0]                  # (1, KW)  f32: 1 for valid words

    BR = img.shape[0]
    KW = cap.shape[0]
    W = words_per_caption
    Kc = KW // W
    Rp = regions
    Bt = BR // Rp

    # 1) Raw attention (MXU, f32 accumulation): s_raw[p, w] = <img_p, cap_w>.
    s_raw = lax.dot_general(img, cap, (((1,), (1,)), ((), ())),
                            preferred_element_type=jnp.float32)      # (BR, KW)

    # 2) raw_feature_norm == 'clipped_l2norm': LeakyReLU(0.1), then l2norm over
    #    the region axis per (image, word).  rsqrt(x + eps^2) ~ 1/(sqrt(x)+eps):
    #    not bit-exact for near-zero norms, well inside the test tolerance.
    s = jnp.where(s_raw > 0.0, s_raw, 0.1 * s_raw)
    s3 = s.reshape(Bt, Rp, KW)                      # free view (Rp % 8 == 0)
    ssq = jnp.sum(s3 * s3, axis=1, keepdims=True)   # (Bt, 1, KW)
    s3 = s3 * lax.rsqrt(ssq + EPS * EPS)

    # 3) Un-normalised softmax weights, invalid words zeroed.  |s3| <= 1, so the
    #    logits are bounded by lambda_softmax and need no max-subtraction.  The
    #    softmax denominator cancels in the cosine similarity and is never built.
    e = jnp.exp(s3 * lambda_softmax).reshape(BR, KW) * wmask         # (BR, KW)

    # 4) Caption-block indicator M (KW, Kc) (no integer division needed) and the
    #    block-diagonal mask as M @ M^T (exact 0/1, tiny MXU matmul).
    wid = lax.broadcasted_iota(jnp.int32, (KW, Kc), 0)
    cstart = lax.broadcasted_iota(jnp.int32, (KW, Kc), 1) * W
    M = jnp.where((wid >= cstart) & (wid < cstart + W), 1.0, 0.0)    # (KW, Kc)
    blk = lax.dot_general(M, M, (((1,), (1,)), ((), ())),
                          preferred_element_type=jnp.float32)        # (KW, KW)

    # 5) Gram trick: wctx is never materialised.
    #      num[p, c]  ~ <img_p, wctx_c>   = sum_{w in c} e_w * s_raw[p, w]
    #      quad[p, c] ~ |wctx_c|^2        = e^T (cap cap^T)|_blockdiag e
    #    (1/softmax-denom and the 0.7 weight_factor are common positive scales
    #    of wctx and cancel in the cosine similarity.)
    gram = lax.dot_general(cap, cap, (((1,), (1,)), ((), ())),
                           preferred_element_type=jnp.float32) * blk  # (KW, KW)
    num = lax.dot_general(e * s_raw, M, (((1,), (0,)), ((), ())),
                          preferred_element_type=jnp.float32)         # (BR, Kc)
    q = lax.dot_general(e, gram, (((1,), (0,)), ((), ())),
                        preferred_element_type=jnp.float32)           # (BR, KW)
    quad = lax.dot_general(e * q, M, (((1,), (0,)), ((), ())),
                           preferred_element_type=jnp.float32)        # (BR, Kc)

    # 6) Cosine similarity: max(sqrt(a)*sqrt(b), eps) folded into
    #    rsqrt(max(a*b, eps^2)) (EUP).  Zero-length / padded captions give
    #    num = quad = 0 -> row_sim = 0 (no NaN/Inf).
    row_sim = num * lax.rsqrt(jnp.maximum(w1sq * quad, EPS * EPS))    # (BR, Kc)

    # 7) agg_func == 'LogSumExp' over the real regions only (rmask kills the
    #    padded ones).  One dense (Bt, Kc) store.
    ex = jnp.exp(row_sim * lambda_lse) * rmask
    ssum = jnp.sum(ex.reshape(Bt, Rp, Kc), axis=1)                    # (Bt, Kc)
    out_ref[0, 0] = jnp.log(ssum) * (1.0 / lambda_lse)


# ---------------------------------------------------------------------------
# Wrapper: scores[i_img, j_cap] = xattn_score_i2t(images, captions)[i, j].
# ---------------------------------------------------------------------------
def xattn_scores_i2t_pallas(images, captions, cap_lens, *,
                            lambda_softmax=9.0, lambda_lse=6.0,
                            captions_per_step=None, images_per_step=None,
                            use_bf16=True):
    B, R, D = images.shape
    Bc, W, Dc = captions.shape
    assert D == Dc

    # ---- caption-axis packing: KW = Kc * W lanes (~ one MXU N tile) ----
    if captions_per_step is None:
        captions_per_step = max(1, min(Bc, -(-_mxu_lane_target() // W)))
    Kc = int(captions_per_step)
    Gc = -(-Bc // Kc)
    Bc_pad = Gc * Kc
    KW = Kc * W

    cap_lens = jnp.asarray(cap_lens, jnp.int32)
    if Bc_pad != Bc:
        captions = jnp.pad(captions, ((0, Bc_pad - Bc), (0, 0), (0, 0)))
        cap_lens = jnp.concatenate(
            [cap_lens, jnp.zeros((Bc_pad - Bc,), jnp.int32)])

    # ---- image-axis tiling (second "parallel" grid axis) ----
    if images_per_step is None:
        images_per_step = min(B, 32)
    Bt = int(images_per_step)
    Gi = -(-B // Bt)
    B_pad = Gi * Bt
    Rp = -(-R // 8) * 8                   # pad regions -> free in-kernel views
    BR = Bt * Rp

    images_p = jnp.pad(images, ((0, B_pad - B), (0, Rp - R), (0, 0)))

    mm_dtype = jnp.bfloat16 if use_bf16 else images.dtype
    img_flat = images_p.astype(mm_dtype).reshape(Gi, BR, D)
    cap_flat = captions.astype(mm_dtype).reshape(Gc, KW, D)

    # Precomputed per-region |img|^2 (f32) and region-validity mask.
    w1sq = jnp.sum(jnp.square(images_p.astype(jnp.float32)), axis=2)  # (B_pad, Rp)
    w1sq = w1sq.reshape(Gi, BR, 1)
    rmask = jnp.broadcast_to((jnp.arange(Rp) < R).astype(jnp.float32),
                             (B_pad, Rp)).reshape(Gi, BR, 1)

    # Precomputed per-word validity mask (no SMEM scalar loop in the kernel).
    wmask = (jnp.arange(W)[None, :] < cap_lens[:, None]).astype(jnp.float32)
    wmask = wmask.reshape(Gc, 1, KW)

    kernel = functools.partial(_score_kernel,
                               lambda_softmax=float(lambda_softmax),
                               lambda_lse=float(lambda_lse),
                               words_per_caption=W, regions=Rp)

    out = pl.pallas_call(
        kernel,
        out_shape=jax.ShapeDtypeStruct((Gi, Gc, Bt, Kc), jnp.float32),
        grid=(Gi, Gc),
        in_specs=[
            pl.BlockSpec((1, BR, D), lambda i, j: (i, 0, 0)),   # images (flat)
            pl.BlockSpec((1, BR, 1), lambda i, j: (i, 0, 0)),   # |img|^2
            pl.BlockSpec((1, BR, 1), lambda i, j: (i, 0, 0)),   # region mask
            pl.BlockSpec((1, KW, D), lambda i, j: (j, 0, 0)),   # captions (flat)
            pl.BlockSpec((1, 1, KW), lambda i, j: (j, 0, 0)),   # word mask
        ],
        out_specs=pl.BlockSpec((1, 1, Bt, Kc), lambda i, j: (i, j, 0, 0)),
        compiler_params=pltpu.CompilerParams(
            dimension_semantics=("parallel", "parallel"),
            vmem_limit_bytes=_vmem_limit_bytes()),
    )(img_flat, w1sq, rmask, cap_flat, wmask)

    scores = out.transpose(0, 2, 1, 3).reshape(B_pad, Bc_pad)
    return scores[:B, :Bc]                 # (n_image, n_caption)


# ---------------------------------------------------------------------------
# Hinge contrastive loss over the tiny (B, B) score matrix -- plain JAX.
# ---------------------------------------------------------------------------
def _hinge_loss(scores, margin, max_violation):
    n = scores.shape[0]
    diag = jnp.diagonal(scores)
    eye = jnp.eye(n, dtype=bool)
    cost_s = jnp.where(eye, 0.0, jnp.maximum(margin + scores - diag[:, None], 0.0))
    cost_im = jnp.where(eye, 0.0, jnp.maximum(margin + scores - diag[None, :], 0.0))
    if max_violation:
        return jnp.sum(jnp.max(cost_s, axis=1)) + jnp.sum(jnp.max(cost_im, axis=0))
    return jnp.sum(cost_s) + jnp.sum(cost_im)


def contrastive_loss_pallas(images, captions, cap_lens, *, margin=0.0,
                            max_violation=False, lambda_softmax=9.0,
                            lambda_lse=6.0, captions_per_step=None,
                            images_per_step=None, use_bf16=True):
    assert images.shape[0] == captions.shape[0], "loss needs square scores"
    scores = xattn_scores_i2t_pallas(
        images, captions, cap_lens, lambda_softmax=lambda_softmax,
        lambda_lse=lambda_lse, captions_per_step=captions_per_step,
        images_per_step=images_per_step, use_bf16=use_bf16)
    return _hinge_loss(scores, margin, max_violation)


# ---------------------------------------------------------------------------
# Pure-JAX reference mirroring the PyTorch module (for verification).
# ---------------------------------------------------------------------------
def _ref_scores_i2t(images, captions, cap_lens, lambda_softmax, lambda_lse,
                    mm_dtype=jnp.float32):
    # Faithful mirror of xattn_score_i2t / func_attention (i2t, clipped_l2norm,
    # LogSumExp); attn_prev treated as zeros.  Matmul inputs are pre-rounded to
    # mm_dtype so it can be precision-matched to the bf16 kernel path.
    images_mm = images.astype(mm_dtype)
    images_f = images_mm.astype(jnp.float32)
    caps_mm = captions.astype(mm_dtype)
    cols = []
    for i in range(captions.shape[0]):
        n_word = int(cap_lens[i])
        cap_i = caps_mm[i, :n_word, :]                        # (Wi, D)
        attn = jnp.einsum('brd,wd->bwr', images_mm, cap_i,
                          preferred_element_type=jnp.float32,
                          precision=lax.Precision.HIGHEST)    # (B, Wi, R)
        attn = jnp.where(attn > 0, attn, 0.1 * attn)          # LeakyReLU(0.1)
        norm = jnp.sqrt(jnp.sum(attn * attn, axis=2, keepdims=True)) + EPS
        attn = attn / norm
        attn = jnp.swapaxes(attn, 1, 2)                       # (B, R, Wi)
        attn = jax.nn.softmax(attn * lambda_softmax, axis=2)
        attnT = 0.7 * jnp.swapaxes(attn, 1, 2)                # attn_prev = 0
        wctx = jnp.einsum('bwr,wd->brd', attnT.astype(mm_dtype), cap_i,
                          preferred_element_type=jnp.float32,
                          precision=lax.Precision.HIGHEST)    # (B, R, D)
        w12 = jnp.sum(images_f * wctx, axis=2)
        w1 = jnp.sqrt(jnp.sum(images_f * images_f, axis=2))
        w2 = jnp.sqrt(jnp.sum(wctx * wctx, axis=2))
        row_sim = w12 / jnp.maximum(w1 * w2, EPS)
        col = jnp.log(jnp.sum(jnp.exp(row_sim * lambda_lse), axis=1,
                              keepdims=True)) / lambda_lse
        cols.append(col)
    return jnp.concatenate(cols, axis=1)                      # (n_image, n_caption)


def _ref_loss(images, captions, cap_lens, margin, max_violation,
              lambda_softmax, lambda_lse, mm_dtype=jnp.float32):
    scores = _ref_scores_i2t(images, captions, cap_lens, lambda_softmax,
                             lambda_lse, mm_dtype=mm_dtype)
    diag = jnp.diagonal(scores)
    cost_s = jnp.maximum(margin + scores - diag[:, None], 0.0)
    cost_im = jnp.maximum(margin + scores - diag[None, :], 0.0)
    eye = jnp.eye(scores.shape[0], dtype=bool)
    cost_s = jnp.where(eye, 0.0, cost_s)
    cost_im = jnp.where(eye, 0.0, cost_im)
    if max_violation:
        return jnp.sum(jnp.max(cost_s, axis=1)) + jnp.sum(jnp.max(cost_im, axis=0))
    return jnp.sum(cost_s) + jnp.sum(cost_im)


# ---------------------------------------------------------------------------
if __name__ == "__main__":
    B = 4      # n_image == n_caption
    R = 16     # image regions
    W = 8      # max words per caption
    D = 32     # feature dim
    margin = 0.2
    lambda_softmax = 9.0
    lambda_lse = 6.0

    key = jax.random.PRNGKey(0)
    k_im, k_cap = jax.random.split(key)
    images = jax.random.normal(k_im, (B, R, D), dtype=jnp.float32)
    captions = jax.random.normal(k_cap, (B, W, D), dtype=jnp.float32)
    cap_lens_py = [8, 6, 8, 5]
    cap_lens = jnp.array(cap_lens_py, dtype=jnp.int32)

    ref32_scores = _ref_scores_i2t(images, captions, cap_lens_py,
                                   lambda_softmax, lambda_lse,
                                   mm_dtype=jnp.float32)
    ref16_scores = _ref_scores_i2t(images, captions, cap_lens_py,
                                   lambda_softmax, lambda_lse,
                                   mm_dtype=jnp.bfloat16)

    # f32 path, default (generation-aware) tiling: single grid cell here.
    s32 = xattn_scores_i2t_pallas(images, captions, cap_lens,
                                  lambda_softmax=lambda_softmax,
                                  lambda_lse=lambda_lse, use_bf16=False)
    s32 = jax.block_until_ready(s32)
    assert s32.shape == (B, B)
    assert jnp.allclose(s32, ref32_scores, rtol=2e-2, atol=2e-2), (
        "f32 scores", s32, ref32_scores)

    # bf16 path forcing caption padding (Kc=3 -> Bc_pad=6) and image tiling
    # (Bt=2 -> 2x2 grid), exercising the multi-step / padded code paths.
    s16 = xattn_scores_i2t_pallas(images, captions, cap_lens,
                                  lambda_softmax=lambda_softmax,
                                  lambda_lse=lambda_lse, use_bf16=True,
                                  captions_per_step=3, images_per_step=2)
    s16 = jax.block_until_ready(s16)
    assert jnp.allclose(s16, ref16_scores, rtol=5e-2, atol=5e-2), (
        "bf16 scores", s16, ref16_scores)

    for max_violation in (False, True):
        loss32 = contrastive_loss_pallas(
            images, captions, cap_lens, margin=margin,
            max_violation=max_violation, lambda_softmax=lambda_softmax,
            lambda_lse=lambda_lse, use_bf16=False)
        loss32 = jax.block_until_ready(loss32)
        ref_l32 = _ref_loss(images, captions, cap_lens_py, margin,
                            max_violation, lambda_softmax, lambda_lse,
                            mm_dtype=jnp.float32)
        assert jnp.allclose(loss32, ref_l32, rtol=2e-2, atol=2e-2), (
            "f32 loss", max_violation, loss32, ref_l32)

        loss16 = contrastive_loss_pallas(
            images, captions, cap_lens, margin=margin,
            max_violation=max_violation, lambda_softmax=lambda_softmax,
            lambda_lse=lambda_lse, use_bf16=True,
            captions_per_step=3, images_per_step=2)
        loss16 = jax.block_until_ready(loss16)
        ref_l16 = _ref_loss(images, captions, cap_lens_py, margin,
                            max_violation, lambda_softmax, lambda_lse,
                            mm_dtype=jnp.bfloat16)
        assert jnp.allclose(loss16, ref_l16, rtol=5e-2, atol=5e-2), (
            "bf16 loss", max_violation, loss16, ref_l16)

    print("KERNEL_OK")
</pallas_src>

<mosaic_0001>
module attributes {stable_mosaic.version = 11 : i64} {
  func.func @_score_kernel(%arg0: i32, %arg1: i32, %arg2: memref<1x64x32xf32, #tpu.memory_space<vmem>>, %arg3: memref<1x64x1xf32, #tpu.memory_space<vmem>>, %arg4: memref<1x64x1xf32, #tpu.memory_space<vmem>>, %arg5: memref<1x32x32xf32, #tpu.memory_space<vmem>>, %arg6: memref<1x1x32xf32, #tpu.memory_space<vmem>>, %arg7: memref<1x1x4x4xf32, #tpu.memory_space<vmem>>) attributes {dimension_semantics = [#tpu.dimension_semantics<parallel>, #tpu.dimension_semantics<parallel>], iteration_bounds = array<i64: 1, 1>, scalar_prefetch = 0 : i64, scratch_operands = 0 : i64, tpu.core_type = #tpu.core_type<tc>, window_params = [{transform_indices = @transform_0, window_bounds = array<i64: 1, 64, 32>}, {transform_indices = @transform_1, window_bounds = array<i64: 1, 64, 1>}, {transform_indices = @transform_2, window_bounds = array<i64: 1, 64, 1>}, {transform_indices = @transform_3, window_bounds = array<i64: 1, 32, 32>}, {transform_indices = @transform_4, window_bounds = array<i64: 1, 1, 32>}, {transform_indices = @transform_5, window_bounds = array<i64: 1, 1, 4, 4>}]} {
    %c0 = arith.constant 0 : index
    %c0_0 = arith.constant 0 : index
    %c0_1 = arith.constant 0 : index
    %0 = vector.load %arg2[%c0, %c0_0, %c0_1] : memref<1x64x32xf32, #tpu.memory_space<vmem>>, vector<1x64x32xf32>
    %1 = vector.shape_cast %0 : vector<1x64x32xf32> to vector<64x32xf32>
    %c0_2 = arith.constant 0 : index
    %c0_3 = arith.constant 0 : index
    %c0_4 = arith.constant 0 : index
    %2 = vector.load %arg5[%c0_2, %c0_3, %c0_4] : memref<1x32x32xf32, #tpu.memory_space<vmem>>, vector<1x32x32xf32>
    %3 = vector.shape_cast %2 : vector<1x32x32xf32> to vector<32x32xf32>
    %c0_5 = arith.constant 0 : index
    %c0_6 = arith.constant 0 : index
    %c0_7 = arith.constant 0 : index
    %4 = vector.load %arg3[%c0_5, %c0_6, %c0_7] : memref<1x64x1xf32, #tpu.memory_space<vmem>>, vector<1x64x1xf32>
    %5 = vector.shape_cast %4 : vector<1x64x1xf32> to vector<64x1xf32>
    %c0_8 = arith.constant 0 : index
    %c0_9 = arith.constant 0 : index
    %c0_10 = arith.constant 0 : index
    %6 = vector.load %arg4[%c0_8, %c0_9, %c0_10] : memref<1x64x1xf32, #tpu.memory_space<vmem>>, vector<1x64x1xf32>
    %7 = vector.shape_cast %6 : vector<1x64x1xf32> to vector<64x1xf32>
    %c0_11 = arith.constant 0 : index
    %c0_12 = arith.constant 0 : index
    %c0_13 = arith.constant 0 : index
    %8 = vector.load %arg6[%c0_11, %c0_12, %c0_13] : memref<1x1x32xf32, #tpu.memory_space<vmem>>, vector<1x1x32xf32>
    %9 = vector.shape_cast %8 : vector<1x1x32xf32> to vector<1x32xf32>
    %cst = arith.constant dense<0.000000e+00> : vector<64x32xf32>
    %10 = tpu.matmul %1, %3, %cst {dimension_numbers = #tpu.dot_dimension_numbers<[1], [1], [0], [0], [0, 0, 1, 0], [], []>} : vector<64x32xf32>, vector<32x32xf32>, vector<64x32xf32> -> vector<64x32xf32>
    %cst_14 = arith.constant 0.000000e+00 : f32
    %11 = vector.broadcast %cst_14 : f32 to vector<64x32xf32>
    %12 = arith.cmpf ogt, %10, %11 : vector<64x32xf32>
    %cst_15 = arith.constant 1.000000e-01 : f32
    %13 = vector.broadcast %cst_15 : f32 to vector<64x32xf32>
    %14 = arith.mulf %13, %10 : vector<64x32xf32>
    %15 = arith.select %12, %10, %14 : vector<64x32xi1>, vector<64x32xf32>
    %16 = vector.shape_cast %15 : vector<64x32xf32> to vector<4x16x32xf32>
    %17 = arith.mulf %16, %16 : vector<4x16x32xf32>
    %cst_16 = arith.constant dense<0.000000e+00> : vector<4x32xf32>
    %18 = vector.multi_reduction <add>, %17, %cst_16 [1] : vector<4x16x32xf32> to vector<4x32xf32>
    %19 = vector.shape_cast %18 : vector<4x32xf32> to vector<4x1x32xf32>
    %cst_17 = arith.constant 1.000000e-16 : f32
    %20 = vector.broadcast %cst_17 : f32 to vector<4x1x32xf32>
    %21 = arith.addf %19, %20 : vector<4x1x32xf32>
    %22 = math.rsqrt %21 : vector<4x1x32xf32>
    %23 = vector.broadcast %22 : vector<4x1x32xf32> to vector<4x16x32xf32>
    %24 = arith.mulf %16, %23 : vector<4x16x32xf32>
    %cst_18 = arith.constant 9.000000e+00 : f32
    %25 = vector.broadcast %cst_18 : f32 to vector<4x16x32xf32>
    %26 = arith.mulf %24, %25 : vector<4x16x32xf32>
    %27 = math.exp %26 : vector<4x16x32xf32>
    %28 = vector.shape_cast %27 : vector<4x16x32xf32> to vector<64x32xf32>
    %29 = vector.broadcast %9 : vector<1x32xf32> to vector<64x32xf32>
    %30 = arith.mulf %28, %29 : vector<64x32xf32>
    %31 = tpu.iota {dimensions = array<i32: 0>} : vector<32x4xi32>
    %32 = tpu.iota {dimensions = array<i32: 1>} : vector<32x4xi32>
    %c8_i32 = arith.constant 8 : i32
    %33 = vector.broadcast %c8_i32 : i32 to vector<32x4xi32>
    %34 = arith.muli %32, %33 : vector<32x4xi32>
    %35 = arith.cmpi sge, %31, %34 : vector<32x4xi32>
    %c8_i32_19 = arith.constant 8 : i32
    %36 = vector.broadcast %c8_i32_19 : i32 to vector<32x4xi32>
    %37 = arith.addi %34, %36 : vector<32x4xi32>
    %38 = arith.cmpi slt, %31, %37 : vector<32x4xi32>
    %39 = arith.andi %35, %38 : vector<32x4xi1>
    %cst_20 = arith.constant 1.000000e+00 : f32
    %cst_21 = arith.constant 0.000000e+00 : f32
    %40 = vector.broadcast %cst_20 : f32 to vector<32x4xf32>
    %41 = vector.broadcast %cst_21 : f32 to vector<32x4xf32>
    %42 = arith.select %39, %40, %41 : vector<32x4xi1>, vector<32x4xf32>
    %cst_22 = arith.constant dense<0.000000e+00> : vector<32x32xf32>
    %43 = tpu.matmul %42, %42, %cst_22 {dimension_numbers = #tpu.dot_dimension_numbers<[1], [1], [0], [0], [0, 0, 1, 0], [], []>} : vector<32x4xf32>, vector<32x4xf32>, vector<32x32xf32> -> vector<32x32xf32>
    %cst_23 = arith.constant dense<0.000000e+00> : vector<32x32xf32>
    %44 = tpu.matmul %3, %3, %cst_23 {dimension_numbers = #tpu.dot_dimension_numbers<[1], [1], [0], [0], [0, 0, 1, 0], [], []>} : vector<32x32xf32>, vector<32x32xf32>, vector<32x32xf32> -> vector<32x32xf32>
    %45 = arith.mulf %44, %43 : vector<32x32xf32>
    %46 = arith.mulf %30, %10 : vector<64x32xf32>
    %cst_24 = arith.constant dense<0.000000e+00> : vector<64x4xf32>
    %47 = tpu.matmul %46, %42, %cst_24 {dimension_numbers = #tpu.dot_dimension_numbers<[1], [0], [0], [1], [0, 0, 1, 1], [], []>} : vector<64x32xf32>, vector<32x4xf32>, vector<64x4xf32> -> vector<64x4xf32>
    %cst_25 = arith.constant dense<0.000000e+00> : vector<64x32xf32>
    %48 = tpu.matmul %30, %45, %cst_25 {dimension_numbers = #tpu.dot_dimension_numbers<[1], [0], [0], [1], [0, 0, 1, 1], [], []>} : vector<64x32xf32>, vector<32x32xf32>, vector<64x32xf32> -> vector<64x32xf32>
    %49 = arith.mulf %30, %48 : vector<64x32xf32>
    %cst_26 = arith.constant dense<0.000000e+00> : vector<64x4xf32>
    %50 = tpu.matmul %49, %42, %cst_26 {dimension_numbers = #tpu.dot_dimension_numbers<[1], [0], [0], [1], [0, 0, 1, 1], [], []>} : vector<64x32xf32>, vector<32x4xf32>, vector<64x4xf32> -> vector<64x4xf32>
    %51 = vector.broadcast %5 : vector<64x1xf32> to vector<64x4xf32>
    %52 = arith.mulf %51, %50 : vector<64x4xf32>
    %cst_27 = arith.constant 1.000000e-16 : f32
    %53 = vector.broadcast %cst_27 : f32 to vector<64x4xf32>
    %54 = arith.maximumf %52, %53 : vector<64x4xf32>
    %55 = math.rsqrt %54 : vector<64x4xf32>
    %56 = arith.mulf %47, %55 : vector<64x4xf32>
    %cst_28 = arith.constant 6.000000e+00 : f32
    %57 = vector.broadcast %cst_28 : f32 to vector<64x4xf32>
    %58 = arith.mulf %56, %57 : vector<64x4xf32>
    %59 = math.exp %58 : vector<64x4xf32>
    %60 = vector.broadcast %7 : vector<64x1xf32> to vector<64x4xf32>
    %61 = arith.mulf %59, %60 : vector<64x4xf32>
    %62 = vector.shape_cast %61 : vector<64x4xf32> to vector<4x16x4xf32>
    %cst_29 = arith.constant dense<0.000000e+00> : vector<4x4xf32>
    %63 = vector.multi_reduction <add>, %62, %cst_29 [1] : vector<4x16x4xf32> to vector<4x4xf32>
    %64 = math.log %63 : vector<4x4xf32>
    %cst_30 = arith.constant 0.166666672 : f32
    %65 = vector.broadcast %cst_30 : f32 to vector<4x4xf32>
    %66 = arith.mulf %64, %65 : vector<4x4xf32>
    %c0_31 = arith.constant 0 : index
    %c0_32 = arith.constant 0 : index
    %c0_33 = arith.constant 0 : index
    %c0_34 = arith.constant 0 : index
    %67 = vector.load %arg7[%c0_31, %c0_32, %c0_33, %c0_34] : memref<1x1x4x4xf32, #tpu.memory_space<vmem>>, vector<1x1x4x4xf32>
    %68 = vector.shape_cast %67 : vector<1x1x4x4xf32> to vector<4x4xf32>
    %69 = vector.shape_cast %66 : vector<4x4xf32> to vector<1x1x4x4xf32>
    tpu.vector_store %arg7[%c0_31, %c0_32, %c0_33, %c0_34], %69 {strides = array<i32>} : memref<1x1x4x4xf32, #tpu.memory_space<vmem>>, vector<1x1x4x4xf32>,
    return
  }
  func.func @transform_0(%arg0: i32, %arg1: i32) -> (i32, i32, i32) {
    %c0_i32 = arith.constant 0 : i32
    %c0_i32_0 = arith.constant 0 : i32
    %c0_i32_1 = arith.constant 0 : i32
    return %arg0, %c0_i32, %c0_i32_0 : i32, i32, i32
  }
  func.func @transform_1(%arg0: i32, %arg1: i32) -> (i32, i32, i32) {
    %c0_i32 = arith.constant 0 : i32
    %c0_i32_0 = arith.constant 0 : i32
    %c0_i32_1 = arith.constant 0 : i32
    return %arg0, %c0_i32, %c0_i32_0 : i32, i32, i32
  }
  func.func @transform_2(%arg0: i32, %arg1: i32) -> (i32, i32, i32) {
    %c0_i32 = arith.constant 0 : i32
    %c0_i32_0 = arith.constant 0 : i32
    %c0_i32_1 = arith.constant 0 : i32
    return %arg0, %c0_i32, %c0_i32_0 : i32, i32, i32
  }
  func.func @transform_3(%arg0: i32, %arg1: i32) -> (i32, i32, i32) {
    %c0_i32 = arith.constant 0 : i32
    %c0_i32_0 = arith.constant 0 : i32
    %c0_i32_1 = arith.constant 0 : i32
    return %arg1, %c0_i32, %c0_i32_0 : i32, i32, i32
  }
  func.func @transform_4(%arg0: i32, %arg1: i32) -> (i32, i32, i32) {
    %c0_i32 = arith.constant 0 : i32
    %c0_i32_0 = arith.constant 0 : i32
    %c0_i32_1 = arith.constant 0 : i32
    return %arg1, %c0_i32, %c0_i32_0 : i32, i32, i32
  }
  func.func @transform_5(%arg0: i32, %arg1: i32) -> (i32, i32, i32, i32) {
    %c0_i32 = arith.constant 0 : i32
    %c0_i32_0 = arith.constant 0 : i32
    %c0_i32_1 = arith.constant 0 : i32
    return %arg0, %arg1, %c0_i32, %c0_i32_0 : i32, i32, i32, i32
  }
}

</mosaic_0001>

<bundles_post_ra>
// kernel: tpu_custom_call.1
= control target key start
LH: loop header
LB: loop body
LE: loop exit
PB: predicated region body
PF: predicated region fallthrough
CT: control target
= control target key end

     0   :  { %vm50_vm0 = vcmask 261120   ;;  %v283_v2 = vlaneseq  ;;  %s1473_s0 = inlined_call_operand.vmem [shape: f32[1,64,32], index: 0, kind: input, shape index: {}]   ;;  %s1474_s1 = inlined_call_operand.vmem [shape: f32[1,64,1], index: 1, kind: input, shape index: {}]   ;;  %s1475_s2 = inlined_call_operand.vmem [shape: f32[1,64,1], index: 2, kind: input, shape index: {}]   ;;  %s1476_s3 = inlined_call_operand.vmem [shape: f32[1,32,32], index: 3, kind: input, shape index: {}]   ;;  %s1477_s4 = inlined_call_operand.vmem [shape: f32[1,1,32], index: 4, kind: input, shape index: {}]   ;;  %s1478_s5 = inlined_call_operand.hbm [shape: f32[1,1,4,4], index: 5, kind: output, shape index: {}]  }
   0x1   :  { %v32_v0 = vld [vmem:[%s1476_s3 + $0x18] sm:$0xff]  ;;  %v31_v1 = vld [vmem:[%s1476_s3 + $0x10] sm:$0xff] }
   0x2   :  { %887 = vmatpush.xpose.msk.msra.mxu0 %vm50_vm0, %v32_v0  ;;  %951 = vmatpush.xpose.msk.msra.mxu2 %vm50_vm0, %v32_v0 }
   0x3   :  { %10 = vsyncpa [#allocation3], 0  ;;  %v289_v3 = vand.u32 127, %v283_v2  ;;  %v1100_v4 = vld [vmem:[%s1476_s3 + $0x8] sm:$0xff]  ;;  %v284_v5 = vshrl.u32 %v283_v2, 7  ;;  %v29_v10 = vld [vmem:[%s1476_s3] sm:$0xff] }
   0x4   :  { %vm308_vm3 = vcmask 31744   ;;  %v1053_v12 = vmov 0.0   ;;  %v21_v15 = vld [vmem:[%s1473_s0] sm:$0xff]  ;;  %v22_v21 = vld [vmem:[%s1473_s0 + $0x8] sm:$0xff]  ;;  %v23_v23 = vld [vmem:[%s1473_s0 + $0x10] sm:$0xff]  ;;  %v1054_v59 = vmov 1.0  }
   0x5   :  { %v290_v6 = vmul.u32 8, %v289_v3  ;;  %v287_v7 = vadd.s32 24, %v284_v5  ;;  %v286_v9 = vadd.s32 16, %v284_v5  ;;  %v285_v17 = vadd.s32 8, %v284_v5  ;;  %v24_v24 = vld [vmem:[%s1473_s0 + $0x18] sm:$0xff]  ;;  %v25_v25 = vld [vmem:[%s1473_s0 + $0x20] sm:$0xff] }
   0x6   :  { %888 = vmatpush.xpose.msk.msra.mxu0 %vm50_vm0, %v31_v1  ;;  %952 = vmatpush.xpose.msk.msra.mxu2 %vm50_vm0, %v31_v1  ;;  %v26_v26 = vld [vmem:[%s1473_s0 + $0x28] sm:$0xff]  ;;  %v27_v27 = vld [vmem:[%s1473_s0 + $0x30] sm:$0xff]  ;;  %v28_v28 = vld [vmem:[%s1473_s0 + $0x38] sm:$0xff]  ;;  %s878_s22 = sshll.u32 %s1478_s5, 4  ;;  %s879_s22 = int_to_ptr.hbm [resolvable:$true] %s878_s22 }
   0x7   :  { %v295_v8 = vadd.s32 8, %v290_v6  ;;  %vm294_vm1 = vcmp.ge.s32.totalorder %v287_v7, %v290_v6  ;;  %vm293_vm5 = vcmp.ge.s32.totalorder %v286_v9, %v290_v6  ;;  %vm291_vm8 = vcmp.ge.s32.totalorder %v284_v5, %v290_v6 }
   0x8   :  { %vm292_vm10 = vcmp.ge.s32.totalorder %v285_v17, %v290_v6 }
   0x9   :  { %vm299_vm2 = vcmp.lt.s32.totalorder %v287_v7, %v295_v8  ;;  %vm298_vm6 = vcmp.lt.s32.totalorder %v286_v9, %v295_v8  ;;  %vm296_vm9 = vcmp.lt.s32.totalorder %v284_v5, %v295_v8  ;;  %vm297_vm11 = vcmp.lt.s32.totalorder %v285_v17, %v295_v8 }
   0xa   :  { %889 = vmatpush.xpose.msk.msra.mxu0 %vm50_vm0, %v1100_v4  ;;  %953 = vmatpush.xpose.msk.msra.mxu2 %vm50_vm0, %v1100_v4  ;;  %vm1109_vm4 = vmand %vm294_vm1, %vm299_vm2 }
   0xb   :  { %v307_v13 = vsel %vm1109_vm4, 1.0, %v1053_v12  ;;  %vm1115_vm7 = vmand %vm293_vm5, %vm298_vm6 }
   0xc   :  { %947 = vmatpush.xpose.msk.msra.mxu3 %vm308_vm3, %v307_v13  ;;  %v306_v16 = vsel %vm1115_vm7, 1.0, %v1053_v12  ;;  %899 = vmatpush.xpose.msk.msra.mxu1 %vm308_vm3, %v307_v13  ;;  %vm1133_vm12 = vmand %vm291_vm8, %vm296_vm9 }
   0xd   :  { %vm1137_vm13 = vmand %vm292_vm10, %vm297_vm11  ;;  %v304_v22 = vsel %vm1133_vm12, 1.0, %v1053_v12 }
   0xe   :  { %890 = vmatpush.xpose.msk.msra.mxu0 %vm50_vm0, %v29_v10  ;;  %954 = vmatpush.xpose.msk.msra.mxu2 %vm50_vm0, %v29_v10  ;;  %v305_v20 = vsel %vm1137_vm13, 1.0, %v1053_v12 }
  0x10   :  { %948 = vmatpush.xpose.msk.msra.mxu3 %vm308_vm3, %v306_v16  ;;  %900 = vmatpush.xpose.msk.msra.mxu1 %vm308_vm3, %v306_v16 }
  0x11   :  { %891 = vmatmul.msk.f32.vlgmr.msra.gmra.mxu0 %vm50_vm0, %v21_v15  ;;  %913 = vmatmul.msk.f32.vlgmr.msra.gmra.mxu2 %vm50_vm0, %v31_v1 }
  0x12   :  { %907 = vmatpush.xpose.msk.msrb.mxu0 %vm50_vm0, %v32_v0  ;;  %935 = vmatpush.msk.msrb.mxu2 %vm1109_vm4, %v1054_v59 }
  0x14   :  { %949 = vmatpush.xpose.msk.msra.mxu3 %vm308_vm3, %v305_v20  ;;  %901 = vmatpush.xpose.msk.msra.mxu1 %vm308_vm3, %v305_v20 }
  0x15   :  { %936 = vmatpush.msk.msrb.mxu2 %vm1115_vm7, %v1054_v59 }
  0x16   :  { %908 = vmatpush.xpose.msk.msrb.mxu0 %vm50_vm0, %v31_v1 }
  0x17   :  { %937 = vmatpush.msk.msrb.mxu2 %vm1137_vm13, %v1054_v59 }
  0x18   :  { %950 = vmatpush.xpose.msk.msra.mxu3 %vm308_vm3, %v304_v22  ;;  %902 = vmatpush.xpose.msk.msra.mxu1 %vm308_vm3, %v304_v22 }
  0x19   :  { %892 = vmatmul.msk.f32.gmra.mxu0 %vm50_vm0, %v22_v21  ;;  %914 = vmatmul.msk.f32.gmra.mxu2 %vm50_vm0, %v32_v0 }
  0x1a   :  { %909 = vmatpush.xpose.msk.msrb.mxu0 %vm50_vm0, %v1100_v4  ;;  %938 = vmatpush.msk.msrb.mxu2 %vm1133_vm12, %v1054_v59 }
  0x1b   :  { %905 = vmatmul.msk.f32.vlgmr.msra.gmra.mxu3 %vm308_vm3, %v306_v16  ;;  %903 = vmatmul.msk.f32.vlgmr.msra.gmra.mxu1 %vm308_vm3, %v304_v22 }
  0x1c   :  { %915 = vmatpush.msk.msrb.mxu3 %vm1109_vm4, %v1054_v59 }
  0x1e   :  { %910 = vmatpush.xpose.msk.msrb.mxu0 %vm50_vm0, %v29_v10  ;;  %916 = vmatpush.msk.msrb.mxu3 %vm1115_vm7, %v1054_v59 }
  0x20   :  { %917 = vmatpush.msk.msrb.mxu3 %vm1137_vm13, %v1054_v59 }
  0x21   :  { %893 = vmatmul.msk.f32.gmra.mxu0 %vm50_vm0, %v23_v23 }
  0x22   :  { %918 = vmatpush.msk.msrb.mxu3 %vm1133_vm12, %v1054_v59 }
  0x23   :  { %906 = vmatmul.msk.f32.gmra.mxu3 %vm308_vm3, %v307_v13  ;;  %904 = vmatmul.msk.f32.gmra.mxu1 %vm308_vm3, %v305_v20 }
  0x29   :  { %894 = vmatmul.msk.f32.gmra.mxu0 %vm50_vm0, %v24_v24 }
  0x31   :  { %895 = vmatmul.msk.f32.gmra.mxu0 %vm50_vm0, %v25_v25 }
  0x39   :  { %896 = vmatmul.msk.f32.gmra.mxu0 %vm50_vm0, %v26_v26 }
  0x41   :  { %897 = vmatmul.msk.f32.gmra.mxu0 %vm50_vm0, %v27_v27 }
  0x49   :  { %898 = vmatmul.msk.f32.gmra.mxu0 %vm50_vm0, %v28_v28 }
  0x51   :  { %911 = vmatmul.msk.f32.vlgmr.msrb.gmra.mxu0 %vm50_vm0, %v29_v10 }
  0x59   :  { %912 = vmatmul.msk.f32.gmra.mxu0 %vm50_vm0, %v1100_v4 }
  0x8e   :  { %v1189_v29 = vpop.f32.mrf.mxu0 }
  0x8f   :  { %v136_v30 = vmul.f32 0.1, %v1189_v29  ;;  %vm128_vm14 = vcmp.gt.f32.partialorder %v1189_v29, 0.0 }
  0x91   :  { %v1194_v31 = vsel %vm128_vm14, %v1189_v29, %v136_v30 }
  0x92   :  { %v152_v34 = vmul.f32 %v1194_v31, %v1194_v31 }
  0x94   :  { %v160_v37 = vsel %vm50_vm0, %v152_v34, 0.0  ;;  %v373_v45 = vpop.f32.mrf.mxu2 }
  0x96   :  { %v1196_v32 = vpop.f32.mrf.mxu0 }
  0x97   :  { %vm129_vm15 = vcmp.gt.f32.partialorder %v1196_v32, 0.0  ;;  %v137_v33 = vmul.f32 0.1, %v1196_v32 }
  0x99   :  { %v1203_v35 = vsel %vm129_vm15, %v1196_v32, %v137_v33 }
  0x9a   :  { %v153_v36 = vmul.f32 %v1203_v35, %v1203_v35 }
  0x9c   :  { %v161_v38 = vsel %vm50_vm0, %v153_v36, 0.0  ;;  %v376_v56 = vpop.f32.mrf.mxu2 }
  0x9d   :  { %v162_v39 = vadd.f32 %v161_v38, %v160_v37 }
  0x9e   :  { %v1209_v40 = vpop.f32.mrf.mxu0  ;;  %v344_v44 = vpop.f32.mrf.mxu3 }
  0x9f   :  { %v163_v41 = vrot.slane %v162_v39, 4  ;;  %v138_v43 = vmul.f32 0.1, %v1209_v40  ;;  %vm130_vm1 = vcmp.gt.f32.partialorder %v1209_v40, 0.0  ;;  %v381_v63 = vmul.f32 %v373_v45, %v344_v44 }
  0xa1   :  { %v164_v42 = vadd.f32 %v163_v41, %v162_v39  ;;  %v1214_v48 = vsel %vm130_vm1, %v1209_v40, %v138_v43 }
  0xa2   :  { %v154_v52 = vmul.f32 %v1214_v48, %v1214_v48 }
  0xa3   :  { %v165_v46 = vrot.slane %v164_v42, 2 }
  0xa4   :  { %v169_v61 = vsel %vm50_vm0, %v154_v52, 0.0  ;;  %v1283_v52 = vld [vmem:[%s1477_s4] ss:$0 sm:$0xff] }
  0xa5   :  { %v166_v47 = vadd.f32 %v165_v46, %v164_v42 }
  0xa6   :  { %v1216_v49 = vpop.f32.mrf.mxu0  ;;  %v347_v55 = vpop.f32.mrf.mxu3 }
  0xa7   :  { %v167_v50 = vrot.slane %v166_v47, 1  ;;  %vm131_vm2 = vcmp.gt.f32.partialorder %v1216_v49, 0.0  ;;  %v139_v51 = vmul.f32 0.1, %v1216_v49  ;;  %v382_v58 = vmul.f32 %v376_v56, %v347_v55 }
  0xa9   :  { %v168_v53 = vadd.f32 %v167_v50, %v166_v47  ;;  %v1223_v54 = vsel %vm131_vm2, %v1216_v49, %v139_v51  ;;  %492 = vmatpush.msrb.mxu1 %v382_v58  ;;  %v338_v58 = vpop.f32.mrf.mxu1 }
  0xaa   :  { %v155_v57 = vmul.f32 %v1223_v54, %v1223_v54 }
  0xab   :  { %v196_v60 = vadd.f32 1e-16, %v168_v53  ;;  %493 = vmatpush.msrb.mxu1 %v381_v63 }
  0xac   :  { %v170_v62 = vsel %vm50_vm0, %v155_v57, 0.0 }
  0xad   :  { %963 = vrsqrt.f32 %v196_v60  ;;  %v171_v0 = vadd.f32 %v170_v62, %v169_v61  ;;  %vm206_vm7 = vweird.f32 %v196_v60 }
  0xae   :  { %v1237_v1 = vpop.f32.mrf.mxu0 }
  0xaf   :  { %v172_v2 = vrot.slane %v171_v0, 4  ;;  %v140_v4 = vmul.f32 0.1, %v1237_v1  ;;  %vm132_vm4 = vcmp.gt.f32.partialorder %v1237_v1, 0.0 }
  0xb1   :  { %v173_v3 = vadd.f32 %v172_v2, %v171_v0  ;;  %v1250_v9 = vsel %vm132_vm4, %v1237_v1, %v140_v4 }
  0xb2   :  { %v156_v15 = vmul.f32 %v1250_v9, %v1250_v9 }
  0xb3   :  { %v964_v5 = vpop.eup %963  ;;  %v174_v6 = vrot.slane %v173_v3, 2 }
  0xb4   :  { %v201_v7 = vmul.f32 %v964_v5, %v196_v60  ;;  %vm207_vm6 = vweird.f32 %v964_v5  ;;  %v178_v22 = vsel %vm50_vm0, %v156_v15, 0.0 }
  0xb5   :  { %v175_v8 = vadd.f32 %v174_v6, %v173_v3  ;;  %vm208_vm8 = vmor %vm206_vm7, %vm207_vm6 }
  0xb6   :  { %v202_v10 = vmul.f32 %v964_v5, %v201_v7  ;;  %v1252_v11 = vpop.f32.mrf.mxu0 }
  0xb7   :  { %v176_v12 = vrot.slane %v175_v8, 1  ;;  %vm133_vm5 = vcmp.gt.f32.partialorder %v1252_v11, 0.0  ;;  %v141_v13 = vmul.f32 0.1, %v1252_v11 }
  0xb8   :  { %v203_v14 = vmul.f32 0.5, %v202_v10 }
  0xb9   :  { %v177_v16 = vadd.f32 %v176_v12, %v175_v8  ;;  %v1259_v17 = vsel %vm133_vm5, %v1252_v11, %v141_v13 }
  0xba   :  { %v204_v18 = vsub.f32 1.5, %v203_v14  ;;  %v157_v19 = vmul.f32 %v1259_v17, %v1259_v17 }
  0xbb   :  { %v197_v20 = vadd.f32 1e-16, %v177_v16 }
  0xbc   :  { %v205_v21 = vmul.f32 %v964_v5, %v204_v18  ;;  %v179_v23 = vsel %vm50_vm0, %v157_v19, 0.0 }
  0xbd   :  { %965 = vrsqrt.f32 %v197_v20  ;;  %v180_v24 = vadd.f32 %v179_v23, %v178_v22  ;;  %vm216_vm12 = vweird.f32 %v197_v20 }
  0xbe   :  { %v209_v25 = vsel %vm208_vm8, %v964_v5, %v205_v21  ;;  %v1265_v26 = vpop.f32.mrf.mxu0  ;;  %v341_v21 = vpop.f32.mrf.mxu1 }
  0xbf   :  { %v240_v27 = vmul.f32 %v209_v25, %v1194_v31  ;;  %v241_v28 = vmul.f32 %v209_v25, %v1203_v35  ;;  %v181_v30 = vrot.slane %v180_v24, 4  ;;  %v142_v37 = vmul.f32 0.1, %v1265_v26 }
  0xc0   :  { %vm134_vm9 = vcmp.gt.f32.partialorder %v1265_v26, 0.0 }
  0xc1   :  { %v248_v33 = vmul.f32 9.0, %v240_v27  ;;  %v249_v34 = vmul.f32 9.0, %v241_v28  ;;  %v182_v36 = vadd.f32 %v181_v30, %v180_v24  ;;  %v1272_v45 = vsel %vm134_vm9, %v1265_v26, %v142_v37 }
  0xc2   :  { %v158_v51 = vmul.f32 %v1272_v45, %v1272_v45 }
  0xc3   :  { %v966_v38 = vpop.eup %965  ;;  %v256_v39 = vmul.f32 1.442695, %v248_v33  ;;  %v183_v41 = vrot.slane %v182_v36, 2  ;;  %v258_v43 = vmul.f32 1.442695, %v249_v34 }
  0xc4   :  { %v211_v42 = vmul.f32 %v966_v38, %v197_v20  ;;  %vm217_vm11 = vweird.f32 %v966_v38  ;;  %v187_v62 = vsel %vm50_vm0, %v158_v51, 0.0 }
  0xc5   :  { %967 = vpow2.f32 %v256_v39  ;;  %v184_v44 = vadd.f32 %v183_v41, %v182_v36  ;;  %vm218_vm13 = vmor %vm216_vm12, %vm217_vm11 }
  0xc6   :  { %v212_v31 = vmul.f32 %v966_v38, %v211_v42  ;;  %v1274_v35 = vpop.f32.mrf.mxu0  ;;  %969 = vpow2.f32 %v258_v43 }
  0xc7   :  { %v185_v46 = vrot.slane %v184_v44, 1  ;;  %vm135_vm10 = vcmp.gt.f32.partialorder %v1274_v35, 0.0  ;;  %v143_v47 = vmul.f32 0.1, %v1274_v35 }
  0xc8   :  { %v213_v50 = vmul.f32 0.5, %v212_v31 }
  0xc9   :  { %v186_v53 = vadd.f32 %v185_v46, %v184_v44  ;;  %v1286_v55 = vsel %vm135_vm10, %v1274_v35, %v143_v47 }
  0xca   :  { %v214_v56 = vsub.f32 1.5, %v213_v50  ;;  %v159_v57 = vmul.f32 %v1286_v55, %v1286_v55 }
  0xcb   :  { %v968_v59 = vpop.eup %967  ;;  %v198_v60 = vadd.f32 1e-16, %v186_v53 }
  0xcc   :  { %v215_v61 = vmul.f32 %v966_v38, %v214_v56  ;;  %v188_v63 = vsel %vm50_vm0, %v159_v57, 0.0  ;;  %v1293_v0 = vmul.f32 %v968_v59, %v1283_v52  ;;  %v970_v6 = vpop.eup %969 }
  0xcd   :  { %971 = vrsqrt.f32 %v198_v60  ;;  %v189_v2 = vadd.f32 %v188_v63, %v187_v62  ;;  %v1301_v15 = vmul.f32 %v970_v6, %v1283_v52  ;;  %vm226_vm15 = vweird.f32 %v198_v60 }
  0xce   :  { %v219_v3 = vsel %vm218_vm13, %v966_v38, %v215_v61  ;;  %v367_v4 = vpop.f32.mrf.mxu0  ;;  %v383_v5 = vmul.f32 %v1293_v0, %v1189_v29 }
  0xcf   :  { %v242_v7 = vmul.f32 %v219_v3, %v1214_v48  ;;  %v243_v8 = vmul.f32 %v219_v3, %v1223_v54  ;;  %v190_v10 = vrot.slane %v189_v2, 4  ;;  %v384_v54 = vmul.f32 %v1301_v15, %v1196_v32 }
  0xd0   :  { %919 = vmatmul.msk.f32.vlgmr.msrb.gmra.mxu3 %vm50_vm0, %v383_v5  ;;  %v379_v30 = vmul.f32 %v367_v4, %v338_v58 }
  0xd1   :  { %v250_v12 = vmul.f32 9.0, %v242_v7  ;;  %v251_v13 = vmul.f32 9.0, %v243_v8  ;;  %v191_v14 = vadd.f32 %v190_v10, %v189_v2 }
  0xd3   :  { %v972_v16 = vpop.eup %971  ;;  %v260_v18 = vmul.f32 1.442695, %v250_v12  ;;  %v192_v19 = vrot.slane %v191_v14, 2  ;;  %v262_v29 = vmul.f32 1.442695, %v251_v13  ;;  %v1055_v12 = vmov 0  }
  0xd4   :  { %v221_v20 = vmul.f32 %v972_v16, %v198_v60  ;;  %vm227_vm14 = vweird.f32 %v972_v16  ;;  %959 = vset.pattern.permute.xlu0 %v1055_v12  ;;  %960 = vset.pattern.permute.xlu1 %v1055_v12 }
  0xd5   :  { %973 = vpow2.f32 %v260_v18  ;;  %v193_v22 = vadd.f32 %v192_v19, %v191_v14  ;;  %vm228_vm1 = vmor %vm226_vm15, %vm227_vm14  ;;  %961 = vset.pattern.permute.xlu2 %v1055_v12  ;;  %v39_v18 = vld [vmem:[%s1474_s1 + $0x30] sm:$0xff] }
  0xd6   :  { %v222_v48 = vmul.f32 %v972_v16, %v221_v20  ;;  %v370_v23 = vpop.f32.mrf.mxu0  ;;  %975 = vpow2.f32 %v262_v29 }
  0xd7   :  { %v194_v24 = vrot.slane %v193_v22, 1  ;;  %v380_v25 = vmul.f32 %v370_v23, %v341_v21  ;;  %v42_v21 = vld [vmem:[%s1475_s2 + $0x8] sm:$0xff] }
  0xd8   :  { %v223_v27 = vmul.f32 0.5, %v222_v48  ;;  %920 = vmatmul.msk.f32.gmra.mxu3 %vm50_vm0, %v384_v54  ;;  %v45_v48 = vld [vmem:[%s1475_s2 + $0x20] sm:$0xff] }
  0xd9   :  { %v195_v28 = vadd.f32 %v194_v24, %v193_v22  ;;  %494 = vmatpush.msrb.mxu1 %v380_v25  ;;  %v37_v24 = vld [vmem:[%s1474_s1 + $0x20] sm:$0xff]  ;;  %v46_v25 = vld [vmem:[%s1475_s2 + $0x28] sm:$0xff] }
  0xda   :  { %v224_v33 = vsub.f32 1.5, %v223_v27  ;;  %v48_v27 = vld [vmem:[%s1475_s2 + $0x38] sm:$0xff]  ;;  %616 = vperm.xlu2 %961, %v37_v24  }
  0xdb   :  { %v974_v34 = vpop.eup %973  ;;  %v199_v36 = vadd.f32 1e-16, %v195_v28  ;;  %495 = vmatpush.msrb.mxu1 %v379_v30 }
  0xdc   :  { %v225_v37 = vmul.f32 %v972_v16, %v224_v33  ;;  %927 = vmatmul.msk.f32.vlgmr.msrb.gmra.mxu1 %vm50_vm0, %v1293_v0  ;;  %v1309_v32 = vmul.f32 %v974_v34, %v1283_v52  ;;  %v976_v41 = vpop.eup %975  ;;  %v38_v33 = vld [vmem:[%s1474_s1 + $0x28] sm:$0xff] }
  0xdd   :  { %977 = vrsqrt.f32 %v199_v36  ;;  %v1317_v46 = vmul.f32 %v976_v41, %v1283_v52  ;;  %vm236_vm4 = vweird.f32 %v199_v36 }
  0xde   :  { %v229_v38 = vsel %vm228_vm1, %v972_v16, %v225_v37  ;;  %v385_v39 = vmul.f32 %v1309_v32, %v1209_v40  ;;  %v36_v16 = vld [vmem:[%s1474_s1 + $0x18] sm:$0xff]  ;;  %v41_v37 = vld [vmem:[%s1475_s2] sm:$0xff] }
  0xdf   :  { %v244_v42 = vmul.f32 %v229_v38, %v1250_v9  ;;  %v245_v43 = vmul.f32 %v229_v38, %v1259_v17  ;;  %v386_v9 = vmul.f32 %v1317_v46, %v1216_v49 }
  0xe0   :  { %921 = vmatmul.msk.f32.gmra.mxu3 %vm50_vm0, %v385_v39  ;;  %v44_v39 = vld [vmem:[%s1475_s2 + $0x18] sm:$0xff] }
  0xe1   :  { %v252_v44 = vmul.f32 9.0, %v244_v42  ;;  %v253_v31 = vmul.f32 9.0, %v245_v43  ;;  %v47_v43 = vld [vmem:[%s1475_s2 + $0x30] sm:$0xff] }
  0xe2   :  { %621 = vperm.xlu2 %961, %v38_v33  }
  0xe3   :  { %v978_v47 = vpop.eup %977  ;;  %v264_v50 = vmul.f32 1.442695, %v252_v44  ;;  %v266_v40 = vmul.f32 1.442695, %v253_v31 }
  0xe4   :  { %v231_v51 = vmul.f32 %v978_v47, %v199_v36  ;;  %928 = vmatmul.msk.f32.gmra.mxu1 %vm50_vm0, %v1301_v15  ;;  %vm237_vm2 = vweird.f32 %v978_v47 }
  0xe5   :  { %979 = vpow2.f32 %v264_v50  ;;  %vm238_vm5 = vmor %vm236_vm4, %vm237_vm2 }
  0xe6   :  { %v232_v53 = vmul.f32 %v978_v47, %v231_v51  ;;  %981 = vpow2.f32 %v266_v40 }
  0xe8   :  { %v233_v17 = vmul.f32 0.5, %v232_v53  ;;  %922 = vmatmul.msk.f32.gmra.mxu3 %vm50_vm0, %v386_v9 }
  0xea   :  { %v234_v56 = vsub.f32 1.5, %v233_v17  ;;  %764 = vperm.xlu2 %961, %v41_v37  }
  0xeb   :  { %v980_v57 = vpop.eup %979 }
  0xec   :  { %v235_v58 = vmul.f32 %v978_v47, %v234_v56  ;;  %929 = vmatmul.msk.f32.gmra.mxu1 %vm50_vm0, %v1309_v32  ;;  %v1327_v59 = vmul.f32 %v980_v57, %v1283_v52  ;;  %v982_v61 = vpop.eup %981 }
  0xed   :  { %v1335_v4 = vmul.f32 %v982_v61, %v1283_v52 }
  0xee   :  { %v239_v60 = vsel %vm238_vm5, %v978_v47, %v235_v58  ;;  %v387_v49 = vmul.f32 %v1327_v59, %v1237_v1 }
  0xef   :  { %v246_v62 = vmul.f32 %v239_v60, %v1272_v45  ;;  %v247_v63 = vmul.f32 %v239_v60, %v1286_v55  ;;  %v388_v1 = vmul.f32 %v1335_v4, %v1252_v11 }
  0xf0   :  { %923 = vmatmul.msk.f32.gmra.mxu3 %vm50_vm0, %v387_v49 }
  0xf1   :  { %v254_v2 = vmul.f32 9.0, %v246_v62  ;;  %v255_v3 = vmul.f32 9.0, %v247_v63 }
  0xf2   :  { %779 = vperm.xlu2 %961, %v44_v39  }
  0xf3   :  { %v268_v5 = vmul.f32 1.442695, %v254_v2  ;;  %v270_v6 = vmul.f32 1.442695, %v255_v3 }
  0xf4   :  { %930 = vmatmul.msk.f32.gmra.mxu1 %vm50_vm0, %v1317_v46 }
  0xf5   :  { %983 = vpow2.f32 %v268_v5 }
  0xf6   :  { %985 = vpow2.f32 %v270_v6 }
  0xf8   :  { %924 = vmatmul.msk.f32.gmra.mxu3 %vm50_vm0, %v388_v1 }
  0xfa   :  { %794 = vperm.xlu2 %961, %v47_v43  }
  0xfb   :  { %v984_v45 = vpop.eup %983 }
  0xfc   :  { %931 = vmatmul.msk.f32.gmra.mxu1 %vm50_vm0, %v1327_v59  ;;  %v281_v55 = vmul.f32 %v984_v45, %v1283_v52  ;;  %v986_v8 = vpop.eup %985 }
  0xfd   :  { %v282_v10 = vmul.f32 %v986_v8, %v1283_v52  ;;  %v34_v52 = vld [vmem:[%s1474_s1 + $0x8] sm:$0xff] }
  0xfe   :  { %v389_v7 = vmul.f32 %v281_v55, %v1265_v26  ;;  %v33_v26 = vld [vmem:[%s1474_s1] sm:$0xff] }
  0xff   :  { %v390_v11 = vmul.f32 %v282_v10, %v1274_v35  ;;  %596 = vperm.xlu0 %959, %v33_v26   ;;  %v35_v35 = vld [vmem:[%s1474_s1 + $0x10] sm:$0xff] }
 0x100   :  { %925 = vmatmul.msk.f32.gmra.mxu3 %vm50_vm0, %v389_v7  ;;  %606 = vperm.xlu1 %960, %v35_v35  }
 0x104   :  { %932 = vmatmul.msk.f32.gmra.mxu1 %vm50_vm0, %v1335_v4 }
 0x107   :  { %601 = vperm.xlu0 %959, %v34_v52  }
 0x108   :  { %926 = vmatmul.msk.f32.gmra.mxu3 %vm50_vm0, %v390_v11  ;;  %611 = vperm.xlu1 %960, %v36_v16  }
 0x10c   :  { %933 = vmatmul.msk.f32.gmra.mxu1 %vm50_vm0, %v281_v55 }
 0x10f   :  { %626 = vperm.xlu0 %959, %v39_v18  }
 0x114   :  { %934 = vmatmul.msk.f32.gmra.mxu1 %vm50_vm0, %v282_v10 }
 0x117   :  { %769 = vperm.xlu0 %959, %v42_v21  }
 0x11f   :  { %784 = vperm.xlu0 %959, %v45_v48  }
 0x127   :  { %799 = vperm.xlu0 %959, %v48_v27  }
 0x134   :  { %v617_v45 = vpop.permute.xlu2 %616 }
 0x153   :  { %v1416_v51 = vpop.f32.mrf.mxu3 }
 0x159   :  { %v497_v13 = vpop.f32.mrf.mxu1 }
 0x15a   :  { %v521_v14 = vmul.f32 %v497_v13, %v1293_v0  ;;  %v40_v0 = vld [vmem:[%s1474_s1 + $0x38] sm:$0xff] }
 0x15b   :  { %631 = vperm.xlu1 %960, %v40_v0   ;;  %v622_v0 = vpop.permute.xlu2 %621 }
 0x15c   :  { %939 = vmatmul.msk.f32.vlgmr.msrb.gmra.mxu2 %vm50_vm0, %v521_v14 }
 0x161   :  { %v500_v19 = vpop.f32.mrf.mxu1 }
 0x162   :  { %v522_v20 = vmul.f32 %v500_v19, %v1301_v15  ;;  %v43_v15 = vld [vmem:[%s1475_s2 + $0x10] sm:$0xff]  ;;  %s1056_s2 = smov [#allocation2]  }
 0x163   :  { %774 = vperm.xlu1 %960, %v43_v15   ;;  %s876_s19 = sshll.u32 %s1056_s2, 4  ;;  %s877_s19 = int_to_ptr.vmem [resolvable:$true] %s876_s19 }
 0x164   :  { %940 = vmatmul.msk.f32.gmra.mxu2 %vm50_vm0, %v522_v20 }
 0x169   :  { %v503_v29 = vpop.f32.mrf.mxu1 }
 0x16a   :  { %v523_v22 = vmul.f32 %v503_v29, %v1309_v32 }
 0x16b   :  { %789 = vperm.xlu1 %960, %v46_v25  }
 0x16c   :  { %941 = vmatmul.msk.f32.gmra.mxu2 %vm50_vm0, %v523_v22 }
 0x171   :  { %v506_v23 = vpop.f32.mrf.mxu1  ;;  %v597_v44 = vpop.permute.xlu0 %596 }
 0x172   :  { %v524_v54 = vmul.f32 %v506_v23, %v1317_v46  ;;  %v607_v9 = vpop.permute.xlu1 %606 }
 0x174   :  { %942 = vmatmul.msk.f32.gmra.mxu2 %vm50_vm0, %v524_v54 }
 0x179   :  { %v509_v28 = vpop.f32.mrf.mxu1  ;;  %v602_v46 = vpop.permute.xlu0 %601 }
 0x17a   :  { %v525_v30 = vmul.f32 %v509_v28, %v1327_v59  ;;  %v1421_v59 = vpop.f32.mrf.mxu3  ;;  %v612_v49 = vpop.permute.xlu1 %611 }
 0x17c   :  { %943 = vmatmul.msk.f32.gmra.mxu2 %vm50_vm0, %v525_v30 }
 0x181   :  { %v512_v34 = vpop.f32.mrf.mxu1 }
 0x182   :  { %v526_v36 = vmul.f32 %v512_v34, %v1335_v4 }
 0x184   :  { %944 = vmatmul.msk.f32.gmra.mxu2 %vm50_vm0, %v526_v36 }
 0x189   :  { %v515_v32 = vpop.f32.mrf.mxu1 }
 0x18a   :  { %v527_v38 = vmul.f32 %v515_v32, %v281_v55  ;;  %v438_v55 = vpop.f32.mrf.mxu3 }
 0x18c   :  { %945 = vmatmul.msk.f32.gmra.mxu2 %vm50_vm0, %v527_v38  ;;  %v627_v38 = vpop.permute.xlu0 %626 }
 0x191   :  { %v518_v41 = vpop.f32.mrf.mxu1 }
 0x192   :  { %v528_v42 = vmul.f32 %v518_v41, %v282_v10  ;;  %v441_v29 = vpop.f32.mrf.mxu3 }
 0x194   :  { %946 = vmatmul.msk.f32.gmra.mxu2 %vm50_vm0, %v528_v42 }
 0x1df   :  { %v570_v31 = vpop.f32.mrf.mxu2 }
 0x1e0   :  { %v634_v40 = vmul.f32 %v597_v44, %v570_v31 }
 0x1e2   :  { %v1418_v17 = vmax.f32 %v634_v40, 1e-16 }
 0x1e4   :  { %vm656_vm15 = vweird.f32 %v1418_v17 }
 0x1e7   :  { %v573_v47 = vpop.f32.mrf.mxu2 }
 0x1e8   :  { %v635_v50 = vmul.f32 %v602_v46, %v573_v47  ;;  %v444_v47 = vpop.f32.mrf.mxu3 }
 0x1ea   :  { %v643_v53 = vmax.f32 %v635_v50, 1e-16 }
 0x1ec   :  { %987 = vrsqrt.f32 %v643_v53  ;;  %vm666_vm7 = vweird.f32 %v643_v53 }
 0x1ed   :  { %989 = vrsqrt.f32 %v1418_v17 }
 0x1ef   :  { %v576_v56 = vpop.f32.mrf.mxu2 }
 0x1f0   :  { %v636_v57 = vmul.f32 %v607_v9, %v576_v56 }
 0x1f2   :  { %v644_v58 = vmax.f32 %v636_v57, 1e-16  ;;  %v1423_v60 = vpop.eup %987 }
 0x1f3   :  { %v1425_v63 = vpop.eup %989  ;;  %v661_v2 = vmul.f32 %v1423_v60, %v643_v53  ;;  %vm667_vm0 = vweird.f32 %v1423_v60 }
 0x1f4   :  { %991 = vrsqrt.f32 %v644_v58  ;;  %v651_v6 = vmul.f32 %v1425_v63, %v1418_v17  ;;  %vm1436_vm9 = vmor %vm666_vm7, %vm667_vm0  ;;  %vm657_vm11 = vweird.f32 %v1425_v63  ;;  %vm676_vm12 = vweird.f32 %v644_v58 }
 0x1f5   :  { %v662_v1 = vmul.f32 %v1423_v60, %v661_v2  ;;  %vm658_vm1 = vmor %vm656_vm15, %vm657_vm11  ;;  %vm866_vm15 = vcmask 1043459  }
 0x1f6   :  { %v652_v10 = vmul.f32 %v1425_v63, %v651_v6  ;;  %v765_v6 = vpop.permute.xlu2 %764 }
 0x1f7   :  { %v579_v61 = vpop.f32.mrf.mxu2  ;;  %v663_v12 = vmul.f32 0.5, %v662_v1 }
 0x1f8   :  { %v637_v62 = vmul.f32 %v612_v49, %v579_v61  ;;  %v653_v14 = vmul.f32 0.5, %v652_v10  ;;  %v632_v61 = vpop.permute.xlu1 %631 }
 0x1f9   :  { %v664_v16 = vsub.f32 1.5, %v663_v12 }
 0x1fa   :  { %v992_v3 = vpop.eup %991  ;;  %v645_v4 = vmax.f32 %v637_v62, 1e-16  ;;  %v654_v22 = vsub.f32 1.5, %v653_v14 }
 0x1fb   :  { %v671_v5 = vmul.f32 %v992_v3, %v644_v58  ;;  %v665_v48 = vmul.f32 %v1423_v60, %v664_v16  ;;  %vm677_vm8 = vweird.f32 %v992_v3 }
 0x1fc   :  { %993 = vrsqrt.f32 %v645_v4  ;;  %vm686_vm10 = vweird.f32 %v645_v4  ;;  %v655_v30 = vmul.f32 %v1425_v63, %v654_v22  ;;  %vm678_vm14 = vmor %vm676_vm12, %vm677_vm8 }
 0x1fd   :  { %v672_v7 = vmul.f32 %v992_v3, %v671_v5  ;;  %v669_v34 = vsel %vm1436_vm9, %v1423_v60, %v665_v48 }
 0x1fe   :  { %v659_v42 = vsel %vm658_vm1, %v1425_v63, %v655_v30  ;;  %v731_v43 = vmul.f32 %v669_v34, %v1421_v59  ;;  %v780_v22 = vpop.permute.xlu2 %779  ;;  %vm869_vm1 = vcmask 27648  }
 0x1ff   :  { %v582_v8 = vpop.f32.mrf.mxu2  ;;  %v673_v52 = vmul.f32 0.5, %v672_v7  ;;  %v730_v9 = vmul.f32 %v659_v42, %v1416_v51 }
 0x200   :  { %v638_v11 = vmul.f32 %v617_v45, %v582_v8  ;;  %v739_v56 = vmul.f32 6.0, %v731_v43 }
 0x201   :  { %v674_v19 = vsub.f32 1.5, %v673_v52  ;;  %v738_v62 = vmul.f32 6.0, %v730_v9 }
 0x202   :  { %v994_v26 = vpop.eup %993  ;;  %v646_v35 = vmax.f32 %v638_v11, 1e-16  ;;  %v447_v11 = vpop.f32.mrf.mxu3 }
 0x203   :  { %v681_v13 = vmul.f32 %v994_v26, %v645_v4  ;;  %vm687_vm6 = vweird.f32 %v994_v26  ;;  %v675_v54 = vmul.f32 %v992_v3, %v674_v19  ;;  %v748_v4 = vmul.f32 1.442695, %v739_v56  ;;  %v775_v19 = vpop.permute.xlu1 %774 }
 0x204   :  { %995 = vrsqrt.f32 %v646_v35  ;;  %vm688_vm13 = vmor %vm686_vm10, %vm687_vm6  ;;  %vm696_vm4 = vweird.f32 %v646_v35  ;;  %v746_v8 = vmul.f32 1.442695, %v738_v62 }
 0x205   :  { %v682_v18 = vmul.f32 %v994_v26, %v681_v13  ;;  %v679_v37 = vsel %vm678_vm14, %v992_v3, %v675_v54  ;;  %v770_v13 = vpop.permute.xlu0 %769  ;;  %vm864_vm14 = vcmask 1042434  }
 0x206   :  { %v732_v46 = vmul.f32 %v679_v37, %v438_v55 }
 0x207   :  { %v683_v20 = vmul.f32 0.5, %v682_v18  ;;  %v585_v21 = vpop.f32.mrf.mxu2 }
 0x208   :  { %v639_v15 = vmul.f32 %v622_v0, %v585_v21  ;;  %v740_v60 = vmul.f32 6.0, %v732_v46 }
 0x209   :  { %v684_v23 = vsub.f32 1.5, %v683_v20 }
 0x20a   :  { %v1434_v24 = vmax.f32 %v639_v15, 1e-16  ;;  %v996_v25 = vpop.eup %995  ;;  %v750_v1 = vmul.f32 1.442695, %v740_v60  ;;  %v450_v27 = vpop.f32.mrf.mxu3 }
 0x20b   :  { %v685_v28 = vmul.f32 %v994_v26, %v684_v23  ;;  %v691_v33 = vmul.f32 %v996_v25, %v646_v35  ;;  %vm697_vm2 = vweird.f32 %v996_v25 }
 0x20c   :  { %997 = vrsqrt.f32 %v1434_v24  ;;  %vm698_vm5 = vmor %vm696_vm4, %vm697_vm2  ;;  %vm706_vm6 = vweird.f32 %v1434_v24 }
 0x20d   :  { %v689_v36 = vsel %vm688_vm13, %v994_v26, %v685_v28  ;;  %v692_v32 = vmul.f32 %v996_v25, %v691_v33 }
 0x20e   :  { %v733_v39 = vmul.f32 %v689_v36, %v441_v29 }
 0x20f   :  { %v588_v41 = vpop.f32.mrf.mxu2  ;;  %v693_v44 = vmul.f32 0.5, %v692_v32 }
 0x210   :  { %v640_v31 = vmul.f32 %v627_v38, %v588_v41  ;;  %v741_v17 = vmul.f32 6.0, %v733_v39  ;;  %v785_v41 = vpop.permute.xlu0 %784 }
 0x211   :  { %v694_v50 = vsub.f32 1.5, %v693_v44 }
 0x212   :  { %v1449_v40 = vmax.f32 %v640_v31, 1e-16  ;;  %v998_v53 = vpop.eup %997  ;;  %v752_v2 = vmul.f32 1.442695, %v741_v17  ;;  %v453_v62 = vpop.f32.mrf.mxu3 }
 0x213   :  { %v695_v57 = vmul.f32 %v996_v25, %v694_v50  ;;  %v701_v58 = vmul.f32 %v998_v53, %v1434_v24  ;;  %vm707_vm0 = vweird.f32 %v998_v53  ;;  %v790_v50 = vpop.permute.xlu1 %789 }
 0x214   :  { %999 = vrsqrt.f32 %v1449_v40  ;;  %vm708_vm7 = vmor %vm706_vm6, %vm707_vm0  ;;  %vm716_vm9 = vweird.f32 %v1449_v40 }
 0x215   :  { %v699_v59 = vsel %vm698_vm5, %v996_v25, %v695_v57  ;;  %v702_v49 = vmul.f32 %v998_v53, %v701_v58  ;;  %1001 = vpow2.f32 %v752_v2 }
 0x216   :  { %v734_v63 = vmul.f32 %v699_v59, %v444_v47  ;;  %1003 = vpow2.f32 %v748_v4 }
 0x217   :  { %v591_v3 = vpop.f32.mrf.mxu2  ;;  %v703_v5 = vmul.f32 0.5, %v702_v49  ;;  %1005 = vpow2.f32 %v750_v1 }
 0x218   :  { %v641_v51 = vmul.f32 %v632_v61, %v591_v3  ;;  %v742_v45 = vmul.f32 6.0, %v734_v63 }
 0x219   :  { %v704_v55 = vsub.f32 1.5, %v703_v5 }
 0x21a   :  { %v1454_v7 = vmax.f32 %v641_v51, 1e-16  ;;  %v1000_v10 = vpop.eup %999  ;;  %v754_v26 = vmul.f32 1.442695, %v742_v45 }
 0x21b   :  { %v705_v12 = vmul.f32 %v998_v53, %v704_v55  ;;  %v711_v52 = vmul.f32 %v1000_v10, %v1449_v40  ;;  %v1002_v18 = vpop.eup %1001  ;;  %vm717_vm8 = vweird.f32 %v1000_v10 }
 0x21c   :  { %1007 = vrsqrt.f32 %v1454_v7  ;;  %v1004_v21 = vpop.eup %1003  ;;  %v805_v54 = vmul.f32 %v1002_v18, %v780_v22  ;;  %vm718_vm10 = vmor %vm716_vm9, %vm717_vm8  ;;  %vm726_vm12 = vweird.f32 %v1454_v7 }
 0x21d   :  { %v709_v35 = vsel %vm708_vm7, %v998_v53, %v705_v12  ;;  %1009 = vpow2.f32 %v746_v8  ;;  %v712_v16 = vmul.f32 %v1000_v10, %v711_v52  ;;  %v1006_v29 = vpop.eup %1005  ;;  %v803_v28 = vmul.f32 %v1004_v21, %v770_v13  ;;  %v795_v12 = vpop.permute.xlu2 %794 }
 0x21e   :  { %v735_v14 = vmul.f32 %v709_v35, %v447_v11  ;;  %1011 = vpow2.f32 %v754_v26  ;;  %v804_v30 = vmul.f32 %v1006_v29, %v775_v19  ;;  %v820_v32 = vsel %vm308_vm3, %v805_v54, 0.0 }
 0x21f   :  { %v713_v0 = vmul.f32 0.5, %v712_v16  ;;  %v811_v42 = vsel %vm308_vm3, %v803_v28, 0.0 }
 0x220   :  { %v743_v20 = vmul.f32 6.0, %v735_v14  ;;  %v819_v43 = vsel %vm308_vm3, %v804_v30, 0.0  ;;  %v800_v14 = vpop.permute.xlu0 %799 }
 0x221   :  { %v714_v48 = vsub.f32 1.5, %v713_v0  ;;  %v821_v47 = vadd.f32 %v820_v32, %v819_v43 }
 0x222   :  { %v756_v15 = vmul.f32 1.442695, %v743_v20  ;;  %v1008_v23 = vpop.eup %1007 }
 0x223   :  { %v1010_v24 = vpop.eup %1009  ;;  %v715_v25 = vmul.f32 %v1000_v10, %v714_v48  ;;  %v721_v33 = vmul.f32 %v1008_v23, %v1454_v7  ;;  %vm727_vm11 = vweird.f32 %v1008_v23  ;;  %v822_v59 = vrot.slane %v821_v47, 4 }
 0x224   :  { %1013 = vpow2.f32 %v756_v15  ;;  %v1012_v34 = vpop.eup %1011  ;;  %v802_v37 = vmul.f32 %v1010_v24, %v765_v6  ;;  %vm728_vm13 = vmor %vm726_vm12, %vm727_vm11 }
 0x225   :  { %v719_v36 = vsel %vm718_vm10, %v1000_v10, %v715_v25  ;;  %v722_v39 = vmul.f32 %v1008_v23, %v721_v33  ;;  %v806_v44 = vmul.f32 %v1012_v34, %v785_v41  ;;  %v823_v5 = vadd.f32 %v822_v59, %v821_v47 }
 0x226   :  { %v736_v38 = vmul.f32 %v719_v36, %v450_v27  ;;  %v810_v53 = vsel %vm308_vm3, %v802_v37, 0.0 }
 0x227   :  { %v723_v31 = vmul.f32 0.5, %v722_v39  ;;  %v812_v56 = vadd.f32 %v811_v42, %v810_v53  ;;  %v828_v57 = vsel %vm308_vm3, %v806_v44, 0.0  ;;  %v824_v55 = vrot.slane %v823_v5, 2 }
 0x228   :  { %v744_v40 = vmul.f32 6.0, %v736_v38 }
 0x229   :  { %v724_v17 = vsub.f32 1.5, %v723_v31  ;;  %v813_v2 = vrot.slane %v812_v56, 4  ;;  %v825_v11 = vadd.f32 %v824_v55, %v823_v5 }
 0x22a   :  { %v1014_v46 = vpop.eup %1013  ;;  %v758_v61 = vmul.f32 1.442695, %v744_v40 }
 0x22b   :  { %v807_v9 = vmul.f32 %v1014_v46, %v790_v50  ;;  %v725_v60 = vmul.f32 %v1008_v23, %v724_v17  ;;  %v814_v1 = vadd.f32 %v813_v2, %v812_v56  ;;  %v826_v18 = vrot.slane %v825_v11, 1 }
 0x22c   :  { %1015 = vpow2.f32 %v758_v61 }
 0x22d   :  { %v829_v58 = vsel %vm308_vm3, %v807_v9, 0.0  ;;  %v729_v63 = vsel %vm728_vm13, %v1008_v23, %v725_v60  ;;  %v815_v7 = vrot.slane %v814_v1, 2  ;;  %v827_v22 = vadd.f32 %v826_v18, %v825_v11 }
 0x22e   :  { %v830_v49 = vadd.f32 %v829_v58, %v828_v57  ;;  %v737_v4 = vmul.f32 %v729_v63, %v453_v62 }
 0x22f   :  { %v816_v13 = vadd.f32 %v815_v7, %v814_v1 }
 0x230   :  { %v831_v3 = vrot.slane %v830_v49, 4  ;;  %v745_v51 = vmul.f32 6.0, %v737_v4 }
 0x231   :  { %v817_v21 = vrot.slane %v816_v13, 1 }
 0x232   :  { %v832_v6 = vadd.f32 %v831_v3, %v830_v49  ;;  %v760_v45 = vmul.f32 1.442695, %v745_v51  ;;  %v1016_v10 = vpop.eup %1015 }
 0x233   :  { %v808_v52 = vmul.f32 %v1016_v10, %v795_v12  ;;  %v818_v23 = vadd.f32 %v817_v21, %v816_v13 }
 0x234   :  { %1017 = vpow2.f32 %v760_v45  ;;  %v833_v8 = vrot.slane %v832_v6, 2 }
 0x235   :  { %v837_v20 = vsel %vm308_vm3, %v808_v52, 0.0  ;;  %1019 = vlog2.f32 %v827_v22 }
 0x236   :  { %v834_v26 = vadd.f32 %v833_v8, %v832_v6 }
 0x238   :  { %v835_v19 = vrot.slane %v834_v26, 1 }
 0x23a   :  { %v1018_v35 = vpop.eup %1017  ;;  %v836_v48 = vadd.f32 %v835_v19, %v834_v26 }
 0x23b   :  { %v809_v16 = vmul.f32 %v1018_v35, %v800_v14  ;;  %v1020_v28 = vpop.eup %1019 }
 0x23c   :  { %1021 = vlog2.f32 %v836_v48  ;;  %v849_v36 = vmul.f32 0.6931472, %v1020_v28 }
 0x23d   :  { %v838_v0 = vsel %vm308_vm3, %v809_v16, 0.0  ;;  %1023 = vlog2.f32 %v818_v23  ;;  %vm862_vm3 = vcmask 1041409  }
 0x23e   :  { %v839_v29 = vadd.f32 %v838_v0, %v837_v20  ;;  %v855_v38 = vmul.f32 0.16666667, %v849_v36 }
 0x240   :  { %v840_v15 = vrot.slane %v839_v29, 4 }
 0x242   :  { %v841_v54 = vadd.f32 %v840_v15, %v839_v29  ;;  %v1022_v33 = vpop.eup %1021 }
 0x243   :  { %v1024_v34 = vpop.eup %1023  ;;  %v851_v37 = vmul.f32 0.6931472, %v1022_v33 }
 0x244   :  { %v842_v24 = vrot.slane %v841_v54, 2  ;;  %v847_v32 = vmul.f32 0.6931472, %v1024_v34 }
 0x245   :  { %v856_v41 = vmul.f32 0.16666667, %v851_v37 }
 0x246   :  { %v843_v25 = vadd.f32 %v842_v24, %v841_v54  ;;  %v854_v42 = vmul.f32 0.16666667, %v847_v32 }
 0x248   :  { %v844_v27 = vrot.slane %v843_v25, 1  ;;  %v863_v31 = vsel %vm862_vm3, %v855_v38, %v854_v42 }
 0x249   :  { %v865_v46 = vsel %vm864_vm14, %v856_v41, %v863_v31 }
 0x24a   :  { %v845_v30 = vadd.f32 %v844_v27, %v843_v25 }
 0x24c   :  { %1025 = vlog2.f32 %v845_v30 }
 0x252   :  { %v1026_v39 = vpop.eup %1025 }
 0x253   :  { %v853_v43 = vmul.f32 0.6931472, %v1026_v39 }
 0x255   :  { %v857_v44 = vmul.f32 0.16666667, %v853_v43 }
 0x257   :  { %v867_v47 = vsel %vm866_vm15, %v857_v44, %v865_v46 }
 0x258   :  { %870 = vst.msk [vmem:[#allocation2] sm:$0xf] %vm869_vm1, %v867_v47 }
 0x259   :  { %881 = dma.vmem_to_hbm [thread:$0]  %s877_s19, 64, %s879_s22, [#allocation3]  }
 0x25a   :  { %1051 = dma.done.wait [#allocation3], 64  }
 0x25b   :  { %1052 = vsyncadd [#allocation3], 4294967232 }
 0x25c   :  { %886 = vsyncpa [#allocation3], 1 }

</bundles_post_ra>
